<compile_context>
chip_gen: v7x
topology: tpu7x:2x2x1
jax: 0.10.0
libtpu: 0.0.40
codegen_flags: <defaults>
</compile_context>

<pallas_src>
import jax
import jax.numpy as jnp
import numpy as np
from jax import lax
from jax.experimental import pallas as pl
from jax.experimental.pallas import tpu as pltpu

# ---------------------------- problem sizes ----------------------------------
B, N, K, S = 2, 32, 16, 8      # batch, filters, chunk length, num chunks
KS = K * S                     # 128  (lane-dense)
LANES = B * KS                 # 256  (both batches folded into the lane axis)
H = 64                         # hidden width of the intra/inter MLPs
EPS = 1e-8                     # gLN epsilon (speechbrain default)

# packed-parameter slab geometry (see pack_params)
W_ROWS = 2 * H + 2 * N         # 192: w1^T(intra), w1^T(inter), w2^T(intra), w2^T(inter)
W_COLS = max(H, N)             # 64
V_ROWS = max(H, N)             # 64
V_COLS = 8                     # b1_i, b1_e, b2_i, b2_e, gamma_i, gamma_e, beta_i, beta_e


# ---------------------------- fused Pallas kernel -----------------------------
def _dual_block_kernel(x_ref, w_ref, v_ref, o_ref):
    """Whole dual-path block in one grid step.

    x_ref / o_ref : (B, N, KS)
    w_ref         : (W_ROWS, W_COLS)  packed, pre-transposed weights
    v_ref         : (V_ROWS, V_COLS)  packed bias / gLN vectors (one per column)
    """
    xb = x_ref[...]                                        # (B, N, KS)
    ww = w_ref[...]                                        # (192, 64)
    vv = v_ref[...]                                        # (64, 8)

    # Fold the batch into the lane axis: each batch already occupies its own
    # 128-lane tile, so this is just placing vregs side by side.
    x = jnp.concatenate([xb[b] for b in range(B)], axis=1)  # (N, LANES)

    # static, aligned slices of the packed weight slab (pre-transposed on host)
    iw1 = ww[0:H, 0:N]                       # (H, N) intra layer-1
    ew1 = ww[H:2 * H, 0:N]                   # (H, N) inter layer-1
    iw2 = ww[2 * H:2 * H + N, 0:H]           # (N, H) intra layer-2
    ew2 = ww[2 * H + N:2 * H + 2 * N, 0:H]   # (N, H) inter layer-2

    ib1, eb1 = vv[:, 0:1], vv[:, 1:2]                      # (H, 1)
    ib2, eb2 = vv[0:N, 2:3], vv[0:N, 3:4]                  # (N, 1)
    ig, eg = vv[0:N, 4:5], vv[0:N, 5:6]                    # (N, 1)
    ibt, ebt = vv[0:N, 6:7], vv[0:N, 7:8]                  # (N, 1)

    lane_idx = lax.broadcasted_iota(jnp.int32, (1, LANES), 1)
    inv_cnt = 1.0 / float(N * KS)

    def mlp(v, w1t, b1, w2t, b2):
        # canonical [M,K]x[K,L] contractions, f32 accumulation on the MXU;
        # one 256-lane matmul per layer covers both batch elements.
        h = lax.dot_general(w1t, v, (((1,), (0,)), ((), ())),
                            preferred_element_type=jnp.float32)   # (H, LANES)
        h = jnp.maximum(h + b1, 0.0)
        y = lax.dot_general(w2t, h, (((1,), (0,)), ((), ())),
                            preferred_element_type=jnp.float32)   # (N, LANES)
        return y + b2

    def gln(y, g, bta):
        # gLN stats over (N, K, S) per batch element; single-pass sum / sumsq.
        mu_row = jnp.zeros((1, LANES), jnp.float32)
        rstd_row = jnp.zeros((1, LANES), jnp.float32)
        for b in range(B):                                  # static unroll, B=2
            sl = y[:, b * KS:(b + 1) * KS]                  # aligned lane tile
            s = jnp.sum(sl)
            s2 = jnp.sum(sl * sl)
            mu = s * inv_cnt
            var = s2 * inv_cnt - mu * mu                    # keep f32
            rstd = lax.rsqrt(var + EPS)                     # EUP, off VALU path
            msk = jnp.logical_and(lane_idx >= b * KS, lane_idx < (b + 1) * KS)
            mu_row = jnp.where(msk, mu, mu_row)
            rstd_row = jnp.where(msk, rstd, rstd_row)
        return g * ((y - mu_row) * rstd_row) + bta

    # ---- intra path + residual ----
    intra = gln(mlp(x, iw1, ib1, iw2, ib2), ig, ibt) + x
    # ---- inter path + residual ----
    out = gln(mlp(intra, ew1, eb1, ew2, eb2), eg, ebt) + intra

    for b in range(B):                                      # aligned, unmasked stores
        o_ref[b] = out[:, b * KS:(b + 1) * KS].astype(o_ref.dtype)


# ---------------------------- host-side packing -------------------------------
def pack_params(p):
    """Pack the 12 tiny tensors into two slabs (done once, outside the hot path)."""
    w = jnp.zeros((W_ROWS, W_COLS), jnp.float32)
    w = w.at[0:H, 0:N].set(p["intra_w1"].T)                 # (H, N)
    w = w.at[H:2 * H, 0:N].set(p["inter_w1"].T)             # (H, N)
    w = w.at[2 * H:2 * H + N, 0:H].set(p["intra_w2"].T)     # (N, H)
    w = w.at[2 * H + N:2 * H + 2 * N, 0:H].set(p["inter_w2"].T)

    v = jnp.zeros((V_ROWS, V_COLS), jnp.float32)
    v = v.at[0:H, 0].set(p["intra_b1"])
    v = v.at[0:H, 1].set(p["inter_b1"])
    v = v.at[0:N, 2].set(p["intra_b2"])
    v = v.at[0:N, 3].set(p["inter_b2"])
    v = v.at[0:N, 4].set(p["intra_gamma"])
    v = v.at[0:N, 5].set(p["inter_gamma"])
    v = v.at[0:N, 6].set(p["intra_beta"])
    v = v.at[0:N, 7].set(p["inter_beta"])
    return w, v


def dual_computation_block(x, wslab, vslab):
    """x: [B, N, K, S] -> out: [B, N, K, S] (matches the PyTorch forward)."""
    b, n, k, s = x.shape
    assert (b, n, k, s) == (B, N, K, S)
    x3 = x.reshape(b, n, k * s)                  # free reshape, stays channel-first

    out = pl.pallas_call(
        _dual_block_kernel,
        out_shape=jax.ShapeDtypeStruct((b, n, k * s), x.dtype),
        grid=(1,),                               # single step: no per-step overhead
        in_specs=[
            pl.BlockSpec((b, n, k * s), lambda i: (0, 0, 0)),
            pl.BlockSpec((W_ROWS, W_COLS), lambda i: (0, 0)),
            pl.BlockSpec((V_ROWS, V_COLS), lambda i: (0, 0)),
        ],
        out_specs=pl.BlockSpec((b, n, k * s), lambda i: (0, 0, 0)),
        compiler_params=pltpu.CompilerParams(
            dimension_semantics=("arbitrary",)),
    )(x3, wslab, vslab)
    return out.reshape(b, n, k, s)


# ---------------------------- pure-JAX reference ------------------------------
# Keeps the original permute structure of the PyTorch forward to confirm the
# fused, permute-free kernel is numerically equivalent.
def reference(x, p):
    def mlp_ref(x2d, w1, b1, w2, b2):
        h = jnp.maximum(x2d @ w1 + b1, 0.0)
        return h @ w2 + b2

    def gln_ref(y, g, bta):
        mu = jnp.mean(y, axis=(1, 2, 3), keepdims=True)
        var = jnp.mean((y - mu) ** 2, axis=(1, 2, 3), keepdims=True)
        return (g.reshape(1, -1, 1, 1) * (y - mu) / jnp.sqrt(var + EPS)
                + bta.reshape(1, -1, 1, 1))

    b, n, k, s = x.shape
    xt = jnp.transpose(x, (0, 3, 2, 1)).reshape(b * s * k, n)
    intra_y = mlp_ref(xt, p["intra_w1"], p["intra_b1"],
                      p["intra_w2"], p["intra_b2"])
    intra_y = jnp.transpose(intra_y.reshape(b, s, k, n), (0, 3, 2, 1))
    intra = gln_ref(intra_y, p["intra_gamma"], p["intra_beta"]) + x

    it = jnp.transpose(intra, (0, 2, 3, 1)).reshape(b * k * s, n)
    inter_y = mlp_ref(it, p["inter_w1"], p["inter_b1"],
                      p["inter_w2"], p["inter_b2"])
    inter_y = jnp.transpose(inter_y.reshape(b, k, s, n), (0, 3, 1, 2))
    out = gln_ref(inter_y, p["inter_gamma"], p["inter_beta"]) + intra
    return out


# ---------------------------- parameter init ----------------------------------
def init_params(key):
    ks = jax.random.split(key, 8)
    scale = 0.1
    return {
        "intra_w1": scale * jax.random.normal(ks[0], (N, H), jnp.float32),
        "intra_b1": scale * jax.random.normal(ks[1], (H,), jnp.float32),
        "intra_w2": scale * jax.random.normal(ks[2], (H, N), jnp.float32),
        "intra_b2": scale * jax.random.normal(ks[3], (N,), jnp.float32),
        "inter_w1": scale * jax.random.normal(ks[4], (N, H), jnp.float32),
        "inter_b1": scale * jax.random.normal(ks[5], (H,), jnp.float32),
        "inter_w2": scale * jax.random.normal(ks[6], (H, N), jnp.float32),
        "inter_b2": scale * jax.random.normal(ks[7], (N,), jnp.float32),
        # gLN affine params (per channel), default init gamma=1, beta=0
        "intra_gamma": jnp.ones((N,), jnp.float32),
        "intra_beta": jnp.zeros((N,), jnp.float32),
        "inter_gamma": jnp.ones((N,), jnp.float32),
        "inter_beta": jnp.zeros((N,), jnp.float32),
    }


if __name__ == "__main__":
    key = jax.random.PRNGKey(0)
    k_x, k_p = jax.random.split(key)
    x = jax.random.normal(k_x, (B, N, K, S), jnp.float32)
    params = init_params(k_p)
    wslab, vslab = pack_params(params)        # packed once, outside the jit'd forward

    fwd = jax.jit(dual_computation_block)
    out = jax.block_until_ready(fwd(x, wslab, vslab))
    ref = jax.block_until_ready(reference(x, params))

    assert out.shape == (B, N, K, S)
    np.testing.assert_allclose(np.asarray(out), np.asarray(ref),
                               rtol=1e-2, atol=1e-2)
    print("KERNEL_OK")
</pallas_src>

<mosaic_0001>
module attributes {stable_mosaic.version = 11 : i64} {
  func.func @_dual_block_kernel(%arg0: i32, %arg1: memref<2x32x128xf32, #tpu.memory_space<vmem>>, %arg2: memref<192x64xf32, #tpu.memory_space<vmem>>, %arg3: memref<64x8xf32, #tpu.memory_space<vmem>>, %arg4: memref<2x32x128xf32, #tpu.memory_space<vmem>>) attributes {dimension_semantics = [#tpu.dimension_semantics<arbitrary>], iteration_bounds = array<i64: 1>, scalar_prefetch = 0 : i64, scratch_operands = 0 : i64, tpu.core_type = #tpu.core_type<tc>, window_params = [{pipeline_mode = #tpu.pipeline_mode<synchronous>, transform_indices = @transform_0, window_bounds = array<i64: 2, 32, 128>}, {pipeline_mode = #tpu.pipeline_mode<synchronous>, transform_indices = @transform_1, window_bounds = array<i64: 192, 64>}, {pipeline_mode = #tpu.pipeline_mode<synchronous>, transform_indices = @transform_2, window_bounds = array<i64: 64, 8>}, {pipeline_mode = #tpu.pipeline_mode<synchronous>, transform_indices = @transform_3, window_bounds = array<i64: 2, 32, 128>}]} {
    %c0 = arith.constant 0 : index
    %c0_0 = arith.constant 0 : index
    %c0_1 = arith.constant 0 : index
    %0 = vector.load %arg1[%c0, %c0_0, %c0_1] : memref<2x32x128xf32, #tpu.memory_space<vmem>>, vector<2x32x128xf32>
    %c0_2 = arith.constant 0 : index
    %c0_3 = arith.constant 0 : index
    %1 = vector.load %arg2[%c0_2, %c0_3] : memref<192x64xf32, #tpu.memory_space<vmem>>, vector<192x64xf32>
    %c0_4 = arith.constant 0 : index
    %c0_5 = arith.constant 0 : index
    %2 = vector.load %arg3[%c0_4, %c0_5] : memref<64x8xf32, #tpu.memory_space<vmem>>, vector<64x8xf32>
    %3 = vector.extract_strided_slice %0 {offsets = [0, 0, 0], sizes = [1, 32, 128], strides = [1, 1, 1]} : vector<2x32x128xf32> to vector<1x32x128xf32>
    %4 = vector.shape_cast %3 : vector<1x32x128xf32> to vector<32x128xf32>
    %5 = vector.extract_strided_slice %0 {offsets = [1, 0, 0], sizes = [1, 32, 128], strides = [1, 1, 1]} : vector<2x32x128xf32> to vector<1x32x128xf32>
    %6 = vector.shape_cast %5 : vector<1x32x128xf32> to vector<32x128xf32>
    %7 = tpu.concatenate %4, %6 in 1 : vector<32x128xf32>, vector<32x128xf32> -> vector<32x256xf32>
    %8 = vector.extract_strided_slice %1 {offsets = [0, 0], sizes = [64, 32], strides = [1, 1]} : vector<192x64xf32> to vector<64x32xf32>
    %9 = vector.extract_strided_slice %1 {offsets = [64, 0], sizes = [64, 32], strides = [1, 1]} : vector<192x64xf32> to vector<64x32xf32>
    %10 = vector.extract_strided_slice %1 {offsets = [128, 0], sizes = [32, 64], strides = [1, 1]} : vector<192x64xf32> to vector<32x64xf32>
    %11 = vector.extract_strided_slice %1 {offsets = [160, 0], sizes = [32, 64], strides = [1, 1]} : vector<192x64xf32> to vector<32x64xf32>
    %12 = vector.extract_strided_slice %2 {offsets = [0, 0], sizes = [64, 1], strides = [1, 1]} : vector<64x8xf32> to vector<64x1xf32>
    %13 = vector.extract_strided_slice %2 {offsets = [0, 1], sizes = [64, 1], strides = [1, 1]} : vector<64x8xf32> to vector<64x1xf32>
    %14 = vector.extract_strided_slice %2 {offsets = [0, 2], sizes = [32, 1], strides = [1, 1]} : vector<64x8xf32> to vector<32x1xf32>
    %15 = vector.extract_strided_slice %2 {offsets = [0, 3], sizes = [32, 1], strides = [1, 1]} : vector<64x8xf32> to vector<32x1xf32>
    %16 = vector.extract_strided_slice %2 {offsets = [0, 4], sizes = [32, 1], strides = [1, 1]} : vector<64x8xf32> to vector<32x1xf32>
    %17 = vector.extract_strided_slice %2 {offsets = [0, 5], sizes = [32, 1], strides = [1, 1]} : vector<64x8xf32> to vector<32x1xf32>
    %18 = vector.extract_strided_slice %2 {offsets = [0, 6], sizes = [32, 1], strides = [1, 1]} : vector<64x8xf32> to vector<32x1xf32>
    %19 = vector.extract_strided_slice %2 {offsets = [0, 7], sizes = [32, 1], strides = [1, 1]} : vector<64x8xf32> to vector<32x1xf32>
    %20 = tpu.iota {dimensions = array<i32: 1>} : vector<1x256xi32>
    %cst = arith.constant dense<0.000000e+00> : vector<64x256xf32>
    %21 = tpu.matmul %8, %7, %cst {dimension_numbers = #tpu.dot_dimension_numbers<[1], [0], [0], [1], [0, 0, 1, 1], [], []>} : vector<64x32xf32>, vector<32x256xf32>, vector<64x256xf32> -> vector<64x256xf32>
    %22 = vector.broadcast %12 : vector<64x1xf32> to vector<64x256xf32>
    %23 = arith.addf %21, %22 : vector<64x256xf32>
    %cst_6 = arith.constant 0.000000e+00 : f32
    %24 = vector.broadcast %cst_6 : f32 to vector<64x256xf32>
    %25 = arith.maximumf %23, %24 : vector<64x256xf32>
    %cst_7 = arith.constant dense<0.000000e+00> : vector<32x256xf32>
    %26 = tpu.matmul %10, %25, %cst_7 {dimension_numbers = #tpu.dot_dimension_numbers<[1], [0], [0], [1], [0, 0, 1, 1], [], []>} : vector<32x64xf32>, vector<64x256xf32>, vector<32x256xf32> -> vector<32x256xf32>
    %27 = vector.broadcast %14 : vector<32x1xf32> to vector<32x256xf32>
    %28 = arith.addf %26, %27 : vector<32x256xf32>
    %cst_8 = arith.constant 0.000000e+00 : f32
    %29 = vector.broadcast %cst_8 : f32 to vector<1x256xf32>
    %cst_9 = arith.constant 0.000000e+00 : f32
    %30 = vector.broadcast %cst_9 : f32 to vector<1x256xf32>
    %31 = vector.extract_strided_slice %28 {offsets = [0, 0], sizes = [32, 128], strides = [1, 1]} : vector<32x256xf32> to vector<32x128xf32>
    %32 = vector.shape_cast %31 : vector<32x128xf32> to vector<1x32x128xf32>
    %cst_10 = arith.constant dense<0.000000e+00> : vector<1xf32>
    %33 = vector.multi_reduction <add>, %32, %cst_10 [1, 2] : vector<1x32x128xf32> to vector<1xf32>
    %34 = vector.shape_cast %33 : vector<1xf32> to vector<1x1x1xf32>
    %35 = vector.extract %34[0, 0, 0] : f32 from vector<1x1x1xf32>
    %36 = arith.mulf %31, %31 : vector<32x128xf32>
    %37 = vector.shape_cast %36 : vector<32x128xf32> to vector<1x32x128xf32>
    %cst_11 = arith.constant dense<0.000000e+00> : vector<1xf32>
    %38 = vector.multi_reduction <add>, %37, %cst_11 [1, 2] : vector<1x32x128xf32> to vector<1xf32>
    %39 = vector.shape_cast %38 : vector<1xf32> to vector<1x1x1xf32>
    %40 = vector.extract %39[0, 0, 0] : f32 from vector<1x1x1xf32>
    %cst_12 = arith.constant 2.44140625E-4 : f32
    %41 = arith.mulf %35, %cst_12 : f32
    %cst_13 = arith.constant 2.44140625E-4 : f32
    %42 = arith.mulf %40, %cst_13 : f32
    %43 = arith.mulf %41, %41 : f32
    %44 = arith.subf %42, %43 : f32
    %cst_14 = arith.constant 9.99999993E-9 : f32
    %45 = arith.addf %44, %cst_14 : f32
    %46 = math.rsqrt %45 : f32
    %c0_i32 = arith.constant 0 : i32
    %47 = vector.broadcast %c0_i32 : i32 to vector<1x256xi32>
    %48 = arith.cmpi sge, %20, %47 : vector<1x256xi32>
    %c128_i32 = arith.constant 128 : i32
    %49 = vector.broadcast %c128_i32 : i32 to vector<1x256xi32>
    %50 = arith.cmpi slt, %20, %49 : vector<1x256xi32>
    %51 = arith.andi %48, %50 : vector<1x256xi1>
    %52 = vector.broadcast %41 : f32 to vector<1x256xf32>
    %53 = arith.select %51, %52, %29 : vector<1x256xi1>, vector<1x256xf32>
    %54 = vector.broadcast %46 : f32 to vector<1x256xf32>
    %55 = arith.select %51, %54, %30 : vector<1x256xi1>, vector<1x256xf32>
    %56 = vector.extract_strided_slice %28 {offsets = [0, 128], sizes = [32, 128], strides = [1, 1]} : vector<32x256xf32> to vector<32x128xf32>
    %57 = vector.shape_cast %56 : vector<32x128xf32> to vector<1x32x128xf32>
    %cst_15 = arith.constant dense<0.000000e+00> : vector<1xf32>
    %58 = vector.multi_reduction <add>, %57, %cst_15 [1, 2] : vector<1x32x128xf32> to vector<1xf32>
    %59 = vector.shape_cast %58 : vector<1xf32> to vector<1x1x1xf32>
    %60 = vector.extract %59[0, 0, 0] : f32 from vector<1x1x1xf32>
    %61 = arith.mulf %56, %56 : vector<32x128xf32>
    %62 = vector.shape_cast %61 : vector<32x128xf32> to vector<1x32x128xf32>
    %cst_16 = arith.constant dense<0.000000e+00> : vector<1xf32>
    %63 = vector.multi_reduction <add>, %62, %cst_16 [1, 2] : vector<1x32x128xf32> to vector<1xf32>
    %64 = vector.shape_cast %63 : vector<1xf32> to vector<1x1x1xf32>
    %65 = vector.extract %64[0, 0, 0] : f32 from vector<1x1x1xf32>
    %cst_17 = arith.constant 2.44140625E-4 : f32
    %66 = arith.mulf %60, %cst_17 : f32
    %cst_18 = arith.constant 2.44140625E-4 : f32
    %67 = arith.mulf %65, %cst_18 : f32
    %68 = arith.mulf %66, %66 : f32
    %69 = arith.subf %67, %68 : f32
    %cst_19 = arith.constant 9.99999993E-9 : f32
    %70 = arith.addf %69, %cst_19 : f32
    %71 = math.rsqrt %70 : f32
    %c128_i32_20 = arith.constant 128 : i32
    %72 = vector.broadcast %c128_i32_20 : i32 to vector<1x256xi32>
    %73 = arith.cmpi sge, %20, %72 : vector<1x256xi32>
    %c256_i32 = arith.constant 256 : i32
    %74 = vector.broadcast %c256_i32 : i32 to vector<1x256xi32>
    %75 = arith.cmpi slt, %20, %74 : vector<1x256xi32>
    %76 = arith.andi %73, %75 : vector<1x256xi1>
    %77 = vector.broadcast %66 : f32 to vector<1x256xf32>
    %78 = arith.select %76, %77, %53 : vector<1x256xi1>, vector<1x256xf32>
    %79 = vector.broadcast %71 : f32 to vector<1x256xf32>
    %80 = arith.select %76, %79, %55 : vector<1x256xi1>, vector<1x256xf32>
    %81 = vector.broadcast %78 : vector<1x256xf32> to vector<32x256xf32>
    %82 = arith.subf %28, %81 : vector<32x256xf32>
    %83 = vector.broadcast %80 : vector<1x256xf32> to vector<32x256xf32>
    %84 = arith.mulf %82, %83 : vector<32x256xf32>
    %85 = vector.broadcast %16 : vector<32x1xf32> to vector<32x256xf32>
    %86 = arith.mulf %85, %84 : vector<32x256xf32>
    %87 = vector.broadcast %18 : vector<32x1xf32> to vector<32x256xf32>
    %88 = arith.addf %86, %87 : vector<32x256xf32>
    %89 = arith.addf %88, %7 : vector<32x256xf32>
    %cst_21 = arith.constant dense<0.000000e+00> : vector<64x256xf32>
    %90 = tpu.matmul %9, %89, %cst_21 {dimension_numbers = #tpu.dot_dimension_numbers<[1], [0], [0], [1], [0, 0, 1, 1], [], []>} : vector<64x32xf32>, vector<32x256xf32>, vector<64x256xf32> -> vector<64x256xf32>
    %91 = vector.broadcast %13 : vector<64x1xf32> to vector<64x256xf32>
    %92 = arith.addf %90, %91 : vector<64x256xf32>
    %cst_22 = arith.constant 0.000000e+00 : f32
    %93 = vector.broadcast %cst_22 : f32 to vector<64x256xf32>
    %94 = arith.maximumf %92, %93 : vector<64x256xf32>
    %cst_23 = arith.constant dense<0.000000e+00> : vector<32x256xf32>
    %95 = tpu.matmul %11, %94, %cst_23 {dimension_numbers = #tpu.dot_dimension_numbers<[1], [0], [0], [1], [0, 0, 1, 1], [], []>} : vector<32x64xf32>, vector<64x256xf32>, vector<32x256xf32> -> vector<32x256xf32>
    %96 = vector.broadcast %15 : vector<32x1xf32> to vector<32x256xf32>
    %97 = arith.addf %95, %96 : vector<32x256xf32>
    %cst_24 = arith.constant 0.000000e+00 : f32
    %98 = vector.broadcast %cst_24 : f32 to vector<1x256xf32>
    %cst_25 = arith.constant 0.000000e+00 : f32
    %99 = vector.broadcast %cst_25 : f32 to vector<1x256xf32>
    %100 = vector.extract_strided_slice %97 {offsets = [0, 0], sizes = [32, 128], strides = [1, 1]} : vector<32x256xf32> to vector<32x128xf32>
    %101 = vector.shape_cast %100 : vector<32x128xf32> to vector<1x32x128xf32>
    %cst_26 = arith.constant dense<0.000000e+00> : vector<1xf32>
    %102 = vector.multi_reduction <add>, %101, %cst_26 [1, 2] : vector<1x32x128xf32> to vector<1xf32>
    %103 = vector.shape_cast %102 : vector<1xf32> to vector<1x1x1xf32>
    %104 = vector.extract %103[0, 0, 0] : f32 from vector<1x1x1xf32>
    %105 = arith.mulf %100, %100 : vector<32x128xf32>
    %106 = vector.shape_cast %105 : vector<32x128xf32> to vector<1x32x128xf32>
    %cst_27 = arith.constant dense<0.000000e+00> : vector<1xf32>
    %107 = vector.multi_reduction <add>, %106, %cst_27 [1, 2] : vector<1x32x128xf32> to vector<1xf32>
    %108 = vector.shape_cast %107 : vector<1xf32> to vector<1x1x1xf32>
    %109 = vector.extract %108[0, 0, 0] : f32 from vector<1x1x1xf32>
    %cst_28 = arith.constant 2.44140625E-4 : f32
    %110 = arith.mulf %104, %cst_28 : f32
    %cst_29 = arith.constant 2.44140625E-4 : f32
    %111 = arith.mulf %109, %cst_29 : f32
    %112 = arith.mulf %110, %110 : f32
    %113 = arith.subf %111, %112 : f32
    %cst_30 = arith.constant 9.99999993E-9 : f32
    %114 = arith.addf %113, %cst_30 : f32
    %115 = math.rsqrt %114 : f32
    %c0_i32_31 = arith.constant 0 : i32
    %116 = vector.broadcast %c0_i32_31 : i32 to vector<1x256xi32>
    %117 = arith.cmpi sge, %20, %116 : vector<1x256xi32>
    %c128_i32_32 = arith.constant 128 : i32
    %118 = vector.broadcast %c128_i32_32 : i32 to vector<1x256xi32>
    %119 = arith.cmpi slt, %20, %118 : vector<1x256xi32>
    %120 = arith.andi %117, %119 : vector<1x256xi1>
    %121 = vector.broadcast %110 : f32 to vector<1x256xf32>
    %122 = arith.select %120, %121, %98 : vector<1x256xi1>, vector<1x256xf32>
    %123 = vector.broadcast %115 : f32 to vector<1x256xf32>
    %124 = arith.select %120, %123, %99 : vector<1x256xi1>, vector<1x256xf32>
    %125 = vector.extract_strided_slice %97 {offsets = [0, 128], sizes = [32, 128], strides = [1, 1]} : vector<32x256xf32> to vector<32x128xf32>
    %126 = vector.shape_cast %125 : vector<32x128xf32> to vector<1x32x128xf32>
    %cst_33 = arith.constant dense<0.000000e+00> : vector<1xf32>
    %127 = vector.multi_reduction <add>, %126, %cst_33 [1, 2] : vector<1x32x128xf32> to vector<1xf32>
    %128 = vector.shape_cast %127 : vector<1xf32> to vector<1x1x1xf32>
    %129 = vector.extract %128[0, 0, 0] : f32 from vector<1x1x1xf32>
    %130 = arith.mulf %125, %125 : vector<32x128xf32>
    %131 = vector.shape_cast %130 : vector<32x128xf32> to vector<1x32x128xf32>
    %cst_34 = arith.constant dense<0.000000e+00> : vector<1xf32>
    %132 = vector.multi_reduction <add>, %131, %cst_34 [1, 2] : vector<1x32x128xf32> to vector<1xf32>
    %133 = vector.shape_cast %132 : vector<1xf32> to vector<1x1x1xf32>
    %134 = vector.extract %133[0, 0, 0] : f32 from vector<1x1x1xf32>
    %cst_35 = arith.constant 2.44140625E-4 : f32
    %135 = arith.mulf %129, %cst_35 : f32
    %cst_36 = arith.constant 2.44140625E-4 : f32
    %136 = arith.mulf %134, %cst_36 : f32
    %137 = arith.mulf %135, %135 : f32
    %138 = arith.subf %136, %137 : f32
    %cst_37 = arith.constant 9.99999993E-9 : f32
    %139 = arith.addf %138, %cst_37 : f32
    %140 = math.rsqrt %139 : f32
    %c128_i32_38 = arith.constant 128 : i32
    %141 = vector.broadcast %c128_i32_38 : i32 to vector<1x256xi32>
    %142 = arith.cmpi sge, %20, %141 : vector<1x256xi32>
    %c256_i32_39 = arith.constant 256 : i32
    %143 = vector.broadcast %c256_i32_39 : i32 to vector<1x256xi32>
    %144 = arith.cmpi slt, %20, %143 : vector<1x256xi32>
    %145 = arith.andi %142, %144 : vector<1x256xi1>
    %146 = vector.broadcast %135 : f32 to vector<1x256xf32>
    %147 = arith.select %145, %146, %122 : vector<1x256xi1>, vector<1x256xf32>
    %148 = vector.broadcast %140 : f32 to vector<1x256xf32>
    %149 = arith.select %145, %148, %124 : vector<1x256xi1>, vector<1x256xf32>
    %150 = vector.broadcast %147 : vector<1x256xf32> to vector<32x256xf32>
    %151 = arith.subf %97, %150 : vector<32x256xf32>
    %152 = vector.broadcast %149 : vector<1x256xf32> to vector<32x256xf32>
    %153 = arith.mulf %151, %152 : vector<32x256xf32>
    %154 = vector.broadcast %17 : vector<32x1xf32> to vector<32x256xf32>
    %155 = arith.mulf %154, %153 : vector<32x256xf32>
    %156 = vector.broadcast %19 : vector<32x1xf32> to vector<32x256xf32>
    %157 = arith.addf %155, %156 : vector<32x256xf32>
    %158 = arith.addf %157, %89 : vector<32x256xf32>
    %159 = vector.extract_strided_slice %158 {offsets = [0, 0], sizes = [32, 128], strides = [1, 1]} : vector<32x256xf32> to vector<32x128xf32>
    %c0_40 = arith.constant 0 : index
    %c0_41 = arith.constant 0 : index
    %c0_42 = arith.constant 0 : index
    %160 = vector.load %arg4[%c0_40, %c0_41, %c0_42] : memref<2x32x128xf32, #tpu.memory_space<vmem>>, vector<1x32x128xf32>
    %161 = vector.shape_cast %160 : vector<1x32x128xf32> to vector<32x128xf32>
    %162 = vector.shape_cast %159 : vector<32x128xf32> to vector<1x32x128xf32>
    tpu.vector_store %arg4[%c0_40, %c0_41, %c0_42], %162 {strides = array<i32>} : memref<2x32x128xf32, #tpu.memory_space<vmem>>, vector<1x32x128xf32>,
    %163 = vector.extract_strided_slice %158 {offsets = [0, 128], sizes = [32, 128], strides = [1, 1]} : vector<32x256xf32> to vector<32x128xf32>
    %c1 = arith.constant 1 : index
    %c0_43 = arith.constant 0 : index
    %c0_44 = arith.constant 0 : index
    %164 = vector.load %arg4[%c1, %c0_43, %c0_44] : memref<2x32x128xf32, #tpu.memory_space<vmem>>, vector<1x32x128xf32>
    %165 = vector.shape_cast %164 : vector<1x32x128xf32> to vector<32x128xf32>
    %166 = vector.shape_cast %163 : vector<32x128xf32> to vector<1x32x128xf32>
    tpu.vector_store %arg4[%c1, %c0_43, %c0_44], %166 {strides = array<i32>} : memref<2x32x128xf32, #tpu.memory_space<vmem>>, vector<1x32x128xf32>,
    return
  }
  func.func @transform_0(%arg0: i32) -> (i32, i32, i32) {
    %c0_i32 = arith.constant 0 : i32
    %c0_i32_0 = arith.constant 0 : i32
    %c0_i32_1 = arith.constant 0 : i32
    %c0_i32_2 = arith.constant 0 : i32
    return %c0_i32, %c0_i32_0, %c0_i32_1 : i32, i32, i32
  }
  func.func @transform_1(%arg0: i32) -> (i32, i32) {
    %c0_i32 = arith.constant 0 : i32
    %c0_i32_0 = arith.constant 0 : i32
    %c0_i32_1 = arith.constant 0 : i32
    return %c0_i32, %c0_i32_0 : i32, i32
  }
  func.func @transform_2(%arg0: i32) -> (i32, i32) {
    %c0_i32 = arith.constant 0 : i32
    %c0_i32_0 = arith.constant 0 : i32
    %c0_i32_1 = arith.constant 0 : i32
    return %c0_i32, %c0_i32_0 : i32, i32
  }
  func.func @transform_3(%arg0: i32) -> (i32, i32, i32) {
    %c0_i32 = arith.constant 0 : i32
    %c0_i32_0 = arith.constant 0 : i32
    %c0_i32_1 = arith.constant 0 : i32
    %c0_i32_2 = arith.constant 0 : i32
    return %c0_i32, %c0_i32_0, %c0_i32_1 : i32, i32, i32
  }
}

</mosaic_0001>

<bundles_post_ra>
// kernel: dual_computation_block.1
= control target key start
LH: loop header
LB: loop body
LE: loop exit
PB: predicated region body
PF: predicated region fallthrough
CT: control target
= control target key end

     0   :  { %v1142_v3 = vmov 0.0   ;;  %v1143_v4 = vmov 0   ;;  %vm97_vm0 = vcmask 261120   ;;  %v1144_v30 = vmov 2   ;;  %s1579_s0 = inlined_call_operand.vmem [shape: f32[2,32,128], index: 0, kind: input, shape index: {}]   ;;  %s1580_s2 = inlined_call_operand.vmem [shape: f32[64,8], index: 2, kind: input, shape index: {}]   ;;  %s1581_s1 = inlined_call_operand.vmem [shape: f32[192,64], index: 1, kind: input, shape index: {}]   ;;  %s1582_s3 = inlined_call_operand.vmem [shape: f32[2,32,128], index: 3, kind: output, shape index: {}]  }
   0x1   :  { %v1174_v0 = vld [vmem:[%s1579_s0 + $0x20] sm:$0xff]  ;;  %v1179_v1 = vld [vmem:[%s1579_s0 + $0x28] sm:$0xff]  ;;  %186 = vmatprep.mubr.f32.mxu0 %v1142_v3  ;;  %1117 = vset.pattern.permute.xlu0 %v1143_v4  ;;  %v1197_v7 = vld [vmem:[%s1579_s0 + $0x30] sm:$0xff]  ;;  %vm267_vm1 = vcmask 523264  }
   0x2   :  { %v1184_v2 = vld [vmem:[%s1579_s0] sm:$0xff]  ;;  %v1036_v5 = vpack.c.bf16 %v1179_v1, %v1174_v0  ;;  %v1192_v6 = vld [vmem:[%s1579_s0 + $0x8] sm:$0xff]  ;;  %v1202_v8 = vld [vmem:[%s1579_s0 + $0x38] sm:$0xff]  ;;  %1118 = vset.pattern.permute.xlu1 %v1143_v4  ;;  %344 = vmatprep.mubr.f32.mxu1 %v1142_v3 }
   0x3   :  { %v1038_v9 = vpack.c.bf16 %v1192_v6, %v1184_v2  ;;  %v1040_v10 = vpack.c.bf16 %v1202_v8, %v1197_v7  ;;  %v1212_v11 = vld [vmem:[%s1579_s0 + $0x10] sm:$0xff]  ;;  %v1217_v12 = vld [vmem:[%s1579_s0 + $0x18] sm:$0xff]  ;;  %v1224_v14 = vld [vmem:[%s1580_s2] sm:$0xff] }
   0x4   :  { %1037 = vmatprep.subr.bf16.mxu0 %v1036_v5  ;;  %v1042_v13 = vpack.c.bf16 %v1217_v12, %v1212_v11  ;;  %59 = vperm.xlu0 %1117, %v1224_v14   ;;  %v1230_v15 = vld [vmem:[%s1580_s2 + $0x10] sm:$0xff]  ;;  %v1235_v16 = vld [vmem:[%s1580_s2 + $0x8] sm:$0xff]  ;;  %v22_v17 = vld [vmem:[%s1581_s1] sm:$0xff] }
   0x5   :  { %1039 = vmatpush1.bf16.msra.mxu0 %v1038_v9  ;;  %69 = vperm.xlu1 %1118, %v1230_v15   ;;  %v1244_v18 = vld [vmem:[%s1580_s2 + $0x18] sm:$0xff]  ;;  %v1252_v19 = vld [vmem:[%s1580_s2 + $0x20] sm:$0xff]  ;;  %v23_v20 = vld [vmem:[%s1581_s1 + $0x8] sm:$0xff] }
   0x6   :  { %1041 = vmatprep.subr.bf16.mxu0 %v1040_v10  ;;  %v1261_v21 = vld [vmem:[%s1580_s2 + $0x28] sm:$0xff]  ;;  %v1269_v22 = vld [vmem:[%s1580_s2 + $0x30] sm:$0xff]  ;;  %v1278_v24 = vld [vmem:[%s1580_s2 + $0x38] sm:$0xff] }
   0x7   :  { %v24_v23 = vld [vmem:[%s1581_s1 + $0x10] sm:$0xff]  ;;  %v25_v25 = vld [vmem:[%s1581_s1 + $0x18] sm:$0xff]  ;;  %v26_v26 = vld [vmem:[%s1581_s1 + $0x20] sm:$0xff] }
   0x8   :  { %64 = vperm.xlu0 %1117, %v1235_v16   ;;  %v27_v27 = vld [vmem:[%s1581_s1 + $0x28] sm:$0xff]  ;;  %v28_v28 = vld [vmem:[%s1581_s1 + $0x30] sm:$0xff]  ;;  %v29_v29 = vld [vmem:[%s1581_s1 + $0x38] sm:$0xff] }
   0x9   :  { %1043 = vmatpush1.bf16.msra.mxu0 %v1042_v13  ;;  %74 = vperm.xlu1 %1118, %v1244_v18  }
   0xc   :  { %1008 = vmatmul.mubr.msk.f32.vlgmr.msra.gmra.mrb[0].mxu0 %vm97_vm0, %v22_v17  ;;  %79 = vperm.xlu0 %1117, %v1252_v19  }
   0xd   :  { %192 = vmatprep.mubr.f32.mxu0 %v1142_v3  ;;  %84 = vperm.xlu1 %1118, %v1261_v21  }
  0x10   :  { %1009 = vmatmul.mubr.msk.f32.gmra.mrb[2].mxu0 %vm97_vm0, %v23_v20  ;;  %89 = vperm.xlu0 %1117, %v1269_v22  }
  0x11   :  { %198 = vmatprep.mubr.f32.mxu0 %v1142_v3  ;;  %94 = vperm.xlu1 %1118, %v1278_v24  }
  0x14   :  { %1010 = vmatmul.mubr.msk.f32.gmra.mrb[4].mxu0 %vm97_vm0, %v24_v23  ;;  %1119 = vset.pattern.permute.xlu0 %v1144_v30 }
  0x15   :  { %204 = vmatprep.mubr.f32.mxu0 %v1142_v3  ;;  %1120 = vset.pattern.permute.xlu1 %v1144_v30 }
  0x16   :  { %252 = vperm.xlu0 %1119, %v1224_v14   ;;  %256 = vperm.xlu1 %1120, %v1235_v16  }
  0x18   :  { %1011 = vmatmul.mubr.msk.f32.gmra.mrb[6].mxu0 %vm97_vm0, %v25_v25 }
  0x19   :  { %210 = vmatprep.mubr.f32.mxu0 %v1142_v3 }
  0x1a   :  { %260 = vperm.xlu1 %1120, %v1230_v15   ;;  %264 = vperm.xlu0 %1119, %v1244_v18  }
  0x1c   :  { %1012 = vmatmul.mubr.msk.f32.gmra.mrb[8].mxu0 %vm97_vm0, %v26_v26 }
  0x1d   :  { %216 = vmatprep.mubr.f32.mxu0 %v1142_v3 }
  0x20   :  { %1013 = vmatmul.mubr.msk.f32.gmra.mrb[10].mxu0 %vm97_vm0, %v27_v27 }
  0x21   :  { %222 = vmatprep.mubr.f32.mxu0 %v1142_v3 }
  0x24   :  { %1014 = vmatmul.mubr.msk.f32.gmra.mrb[12].mxu0 %vm97_vm0, %v28_v28 }
  0x25   :  { %228 = vmatprep.mubr.f32.mxu0 %v1142_v3 }
  0x28   :  { %1015 = vmatmul.mubr.msk.f32.gmra.mrb[14].mxu0 %vm97_vm0, %v29_v29 }
  0x29   :  { %814 = vmatprep.mubr.f32.mxu0 %v1142_v3 }
  0x83   :  { %v60_v31 = vpop.permute.xlu0 %59 }
  0x84   :  { %v70_v40 = vpop.permute.xlu1 %69 }
  0x87   :  { %v65_v34 = vpop.permute.xlu0 %64 }
  0x88   :  { %v75_v51 = vpop.permute.xlu1 %74 }
  0x8b   :  { %v80_v4 = vpop.permute.xlu0 %79 }
  0x8c   :  { %v85_v10 = vpop.permute.xlu1 %84 }
  0xdf   :  { %v188_v32 = vpop.f32.mrb[0].mxu0 }
  0xe0   :  { %v190_v33 = vpop.f32.mrb[1].mxu0  ;;  %v189_v35 = vadd.f32 %v188_v32, %v60_v31 }
  0xe1   :  { %v191_v36 = vadd.f32 %v190_v33, %v60_v31  ;;  %v90_v33 = vpop.permute.xlu0 %89 }
  0xe2   :  { %v235_v42 = vmax.f32 %v189_v35, 0.0 }
  0xe3   :  { %v194_v37 = vpop.f32.mrb[2].mxu0  ;;  %v236_v44 = vmax.f32 %v191_v36, 0.0  ;;  %v95_v36 = vpop.permute.xlu1 %94 }
  0xe4   :  { %v195_v38 = vadd.f32 %v194_v37, %v65_v34  ;;  %v196_v39 = vpop.f32.mrb[3].mxu0 }
  0xe5   :  { %v197_v41 = vadd.f32 %v196_v39, %v65_v34 }
  0xe6   :  { %v237_v43 = vmax.f32 %v195_v38, 0.0 }
  0xe7   :  { %v238_v45 = vmax.f32 %v197_v41, 0.0  ;;  %v200_v46 = vpop.f32.mrb[4].mxu0 }
  0xe8   :  { %v202_v47 = vpop.f32.mrb[5].mxu0  ;;  %v1046_v48 = vpack.c.bf16 %v237_v43, %v235_v42  ;;  %v201_v50 = vadd.f32 %v200_v46, %v70_v40 }
  0xe9   :  { %v1044_v49 = vpack.c.bf16 %v238_v45, %v236_v44  ;;  %v203_v52 = vadd.f32 %v202_v47, %v70_v40 }
  0xea   :  { %v239_v57 = vmax.f32 %v201_v50, 0.0  ;;  %v40_v50 = vld [vmem:[%s1581_s1 + $0x90] sm:$0xff] }
  0xeb   :  { %v206_v53 = vpop.f32.mrb[6].mxu0  ;;  %1045 = vmatprep.subr.bf16.mxu1 %v1044_v49  ;;  %v240_v59 = vmax.f32 %v203_v52, 0.0  ;;  %v39_v49 = vld [vmem:[%s1581_s1 + $0x88] sm:$0xff]  ;;  %v1145_v52 = vmov 4  }
  0xec   :  { %v207_v54 = vadd.f32 %v206_v53, %v75_v51  ;;  %v208_v55 = vpop.f32.mrb[7].mxu0  ;;  %1047 = vmatpush1.bf16.msra.mxu1 %v1046_v48  ;;  %v38_v48 = vld [vmem:[%s1581_s1 + $0x80] sm:$0xff]  ;;  %1122 = vset.pattern.permute.xlu1 %v1145_v52 }
  0xed   :  { %v209_v56 = vadd.f32 %v208_v55, %v75_v51  ;;  %v41_v51 = vld [vmem:[%s1581_s1 + $0x98] sm:$0xff]  ;;  %1121 = vset.pattern.permute.xlu0 %v1145_v52  ;;  %v257_v55 = vpop.permute.xlu1 %256 }
  0xee   :  { %v241_v58 = vmax.f32 %v207_v54, 0.0 }
  0xef   :  { %v242_v60 = vmax.f32 %v209_v56, 0.0  ;;  %v212_v61 = vpop.f32.mrb[8].mxu0  ;;  %v253_v56 = vpop.permute.xlu0 %252 }
  0xf0   :  { %v1050_v62 = vpack.c.bf16 %v241_v58, %v239_v57  ;;  %v214_v63 = vpop.f32.mrb[9].mxu0  ;;  %v213_v9 = vadd.f32 %v212_v61, %v80_v4 }
  0xf1   :  { %v1048_v5 = vpack.c.bf16 %v242_v60, %v240_v59  ;;  %v215_v13 = vadd.f32 %v214_v63, %v80_v4  ;;  %v261_v63 = vpop.permute.xlu1 %260 }
  0xf2   :  { %v243_v26 = vmax.f32 %v213_v9, 0.0 }
  0xf3   :  { %v218_v17 = vpop.f32.mrb[10].mxu0  ;;  %1049 = vmatprep.subr.bf16.mxu1 %v1048_v5  ;;  %v244_v28 = vmax.f32 %v215_v13, 0.0 }
  0xf4   :  { %v219_v20 = vadd.f32 %v218_v17, %v85_v10  ;;  %v220_v23 = vpop.f32.mrb[11].mxu0  ;;  %1051 = vmatpush1.bf16.msra.mxu1 %v1050_v62 }
  0xf5   :  { %v221_v25 = vadd.f32 %v220_v23, %v85_v10 }
  0xf6   :  { %v245_v27 = vmax.f32 %v219_v20, 0.0 }
  0xf7   :  { %v246_v29 = vmax.f32 %v221_v25, 0.0  ;;  %v224_v30 = vpop.f32.mrb[12].mxu0 }
  0xf8   :  { %v1054_v31 = vpack.c.bf16 %v245_v27, %v243_v26  ;;  %v226_v32 = vpop.f32.mrb[13].mxu0  ;;  %v225_v35 = vadd.f32 %v224_v30, %v90_v33  ;;  %v265_v27 = vpop.permute.xlu0 %264 }
  0xf9   :  { %v1052_v34 = vpack.c.bf16 %v246_v29, %v244_v28  ;;  %v227_v37 = vadd.f32 %v226_v32, %v90_v33 }
  0xfa   :  { %v247_v42 = vmax.f32 %v225_v35, 0.0 }
  0xfb   :  { %v230_v38 = vpop.f32.mrb[14].mxu0  ;;  %1053 = vmatprep.subr.bf16.mxu1 %v1052_v34  ;;  %v248_v44 = vmax.f32 %v227_v37, 0.0 }
  0xfc   :  { %v231_v39 = vadd.f32 %v230_v38, %v95_v36  ;;  %v232_v40 = vpop.f32.mrb[15].mxu0  ;;  %1055 = vmatpush1.bf16.msra.mxu1 %v1054_v31 }
  0xfd   :  { %v233_v41 = vadd.f32 %v232_v40, %v95_v36 }
  0xfe   :  { %v249_v43 = vmax.f32 %v231_v39, 0.0 }
  0xff   :  { %v250_v45 = vmax.f32 %v233_v41, 0.0 }
 0x100   :  { %v1058_v46 = vpack.c.bf16 %v249_v43, %v247_v42 }
 0x101   :  { %v1056_v47 = vpack.c.bf16 %v250_v45, %v248_v44 }
 0x103   :  { %1057 = vmatprep.subr.bf16.mxu1 %v1056_v47 }
 0x104   :  { %1059 = vmatpush1.bf16.msra.mxu1 %v1058_v46  ;;  %v1146_v46 = vmov 6  }
 0x107   :  { %1016 = vmatmul.mubr.msk.f32.vlgmr.msra.gmra.mrb[0].mxu1 %vm267_vm1, %v38_v48 }
 0x108   :  { %350 = vmatprep.mubr.f32.mxu1 %v1142_v3 }
 0x10b   :  { %1017 = vmatmul.mubr.msk.f32.gmra.mrb[2].mxu1 %vm267_vm1, %v39_v49 }
 0x10c   :  { %356 = vmatprep.mubr.f32.mxu1 %v1142_v3 }
 0x10f   :  { %1018 = vmatmul.mubr.msk.f32.gmra.mrb[4].mxu1 %vm267_vm1, %v40_v50 }
 0x110   :  { %362 = vmatprep.mubr.f32.mxu1 %v1142_v3 }
 0x113   :  { %1019 = vmatmul.mubr.msk.f32.gmra.mrb[6].mxu1 %vm267_vm1, %v41_v51 }
 0x114   :  { %657 = vmatprep.mubr.f32.mxu1 %v1142_v3 }
 0x1da   :  { %v346_v53 = vpop.f32.mrb[0].mxu1 }
 0x1db   :  { %v348_v54 = vpop.f32.mrb[1].mxu1  ;;  %v1337_v61 = vadd.f32 %v346_v53, %v253_v56 }
 0x1dc   :  { %v1339_v62 = vadd.f32 %v348_v54, %v253_v56 }
 0x1dd   :  { %v381_v20 = vmul.f32 %v1337_v61, %v1337_v61 }
 0x1de   :  { %v352_v57 = vpop.f32.mrb[2].mxu1  ;;  %v429_v26 = vmul.f32 %v1339_v62, %v1339_v62 }
 0x1df   :  { %v1333_v58 = vadd.f32 %v352_v57, %v257_v55  ;;  %v354_v59 = vpop.f32.mrb[3].mxu1 }
 0x1e0   :  { %v1335_v60 = vadd.f32 %v354_v59, %v257_v55 }
 0x1e1   :  { %v382_v5 = vmul.f32 %v1333_v58, %v1333_v58  ;;  %v369_v23 = vadd.f32 %v1333_v58, %v1337_v61 }
 0x1e2   :  { %v358_v4 = vpop.f32.mrb[4].mxu1  ;;  %v430_v13 = vmul.f32 %v1335_v60, %v1335_v60  ;;  %v417_v41 = vadd.f32 %v1335_v60, %v1339_v62 }
 0x1e3   :  { %v1343_v9 = vadd.f32 %v358_v4, %v261_v63  ;;  %v360_v10 = vpop.f32.mrb[5].mxu1  ;;  %v385_v33 = vadd.f32 %v382_v5, %v381_v20 }
 0x1e4   :  { %v1347_v17 = vadd.f32 %v360_v10, %v261_v63  ;;  %v433_v35 = vadd.f32 %v430_v13, %v429_v26 }
 0x1e5   :  { %v383_v25 = vmul.f32 %v1343_v9, %v1343_v9  ;;  %v370_v32 = vadd.f32 %v369_v23, %v1343_v9 }
 0x1e6   :  { %v431_v28 = vmul.f32 %v1347_v17, %v1347_v17  ;;  %v364_v29 = vpop.f32.mrb[6].mxu1  ;;  %v418_v44 = vadd.f32 %v417_v41, %v1347_v17 }
 0x1e7   :  { %v1359_v30 = vadd.f32 %v364_v29, %v265_v27  ;;  %v366_v31 = vpop.f32.mrb[7].mxu1  ;;  %v386_v38 = vadd.f32 %v385_v33, %v383_v25 }
 0x1e8   :  { %v1362_v34 = vadd.f32 %v366_v31, %v265_v27  ;;  %v434_v40 = vadd.f32 %v433_v35, %v431_v28 }
 0x1e9   :  { %v371_v36 = vadd.f32 %v370_v32, %v1359_v30  ;;  %v384_v37 = vmul.f32 %v1359_v30, %v1359_v30 }
 0x1ea   :  { %v432_v39 = vmul.f32 %v1362_v34, %v1362_v34  ;;  %v419_v45 = vadd.f32 %v418_v44, %v1362_v34 }
 0x1eb   :  { %372 = vadd.xlane.f32.xlu1 %v371_v36  ;;  %v387_v42 = vadd.f32 %v386_v38, %v384_v37  ;;  %v1147_v38 = vmov 1  }
 0x1ec   :  { %v435_v43 = vadd.f32 %v434_v40, %v432_v39 }
 0x1ed   :  { %388 = vadd.xlane.f32.xlu0 %v387_v42 }
 0x1ef   :  { %436 = vadd.xlane.f32.xlu1 %v435_v43 }
 0x1f1   :  { %420 = vadd.xlane.f32.xlu0 %v419_v45 }
 0x200   :  { %486 = vperm.xlu1 %1122, %v1235_v16  }
 0x204   :  { %1123 = vset.pattern.permute.xlu1 %v1146_v46 }
 0x205   :  { %506 = vperm.xlu1 %1123, %v1224_v14  }
 0x207   :  { %482 = vperm.xlu0 %1121, %v1224_v14  }
 0x209   :  { %510 = vperm.xlu1 %1123, %v1235_v16  }
 0x20b   :  { %1127 = vset.pattern.permute.xlu0 %v1147_v38 }
 0x20c   :  { %542 = vperm.xlu0 %1127, %v1235_v16  }
 0x20d   :  { %1124 = vset.pattern.permute.xlu1 %v1145_v52 }
 0x20e   :  { %490 = vperm.xlu1 %1124, %v1230_v15  }
 0x210   :  { %554 = vperm.xlu0 %1127, %v1252_v19  }
 0x212   :  { %494 = vperm.xlu1 %1124, %v1244_v18  }
 0x214   :  { %562 = vperm.xlu0 %1127, %v1269_v22  }
 0x216   :  { %1125 = vset.pattern.permute.xlu1 %v1146_v46 }
 0x217   :  { %514 = vperm.xlu1 %1125, %v1230_v15  }
 0x21b   :  { %518 = vperm.xlu1 %1125, %v1244_v18  }
 0x21f   :  { %1126 = vset.pattern.permute.xlu1 %v1147_v38 }
 0x220   :  { %538 = vperm.xlu1 %1126, %v1224_v14  }
 0x224   :  { %546 = vperm.xlu1 %1126, %v1230_v15  }
 0x228   :  { %550 = vperm.xlu1 %1126, %v1244_v18  }
 0x22c   :  { %558 = vperm.xlu1 %1126, %v1261_v21  }
 0x230   :  { %566 = vperm.xlu1 %1126, %v1278_v24  }
 0x278   :  { %v373_v47 = vpop.xlane.xlu1 %372 }
 0x279   :  { %v374_v48 = vrot.slane %v373_v47, 4 }
 0x27a   :  { %v389_v49 = vpop.xlane.xlu0 %388 }
 0x27b   :  { %v375_v50 = vadd.f32 %v374_v48, %v373_v47  ;;  %v390_v51 = vrot.slane %v389_v49, 4 }
 0x27c   :  { %v437_v10 = vpop.xlane.xlu1 %436 }
 0x27d   :  { %v376_v53 = vrot.slane %v375_v50, 2  ;;  %v391_v54 = vadd.f32 %v390_v51, %v389_v49  ;;  %v438_v20 = vrot.slane %v437_v10, 4 }
 0x27e   :  { %v421_v5 = vpop.xlane.xlu0 %420 }
 0x27f   :  { %v392_v55 = vrot.slane %v391_v54, 2  ;;  %v377_v56 = vadd.f32 %v376_v53, %v375_v50  ;;  %v422_v13 = vrot.slane %v421_v5, 4  ;;  %v439_v25 = vadd.f32 %v438_v20, %v437_v10 }
 0x281   :  { %v378_v57 = vrot.slane %v377_v56, 1  ;;  %v393_v52 = vadd.f32 %v392_v55, %v391_v54  ;;  %v423_v23 = vadd.f32 %v422_v13, %v421_v5  ;;  %v440_v27 = vrot.slane %v439_v25, 2 }
 0x283   :  { %v379_v59 = vadd.f32 %v378_v57, %v377_v56  ;;  %v394_v63 = vrot.slane %v393_v52, 1  ;;  %v424_v26 = vrot.slane %v423_v23, 2  ;;  %v441_v31 = vadd.f32 %v440_v27, %v439_v25 }
 0x285   :  { %1084 = vpush %v379_v59  ;;  %v395_v4 = vadd.f32 %v394_v63, %v393_v52  ;;  %v425_v29 = vadd.f32 %v424_v26, %v423_v23  ;;  %v442_v33 = vrot.slane %v441_v31, 1 }
 0x286   :  { %v483_v50 = vpop.permute.xlu0 %482 }
 0x287   :  { %1086 = vpush %v395_v4  ;;  %v426_v32 = vrot.slane %v425_v29, 1  ;;  %v443_v37 = vadd.f32 %v442_v33, %v441_v31 }
 0x289   :  { %v427_v36 = vadd.f32 %v426_v32, %v425_v29 }
 0x2b6   :  { %s1085_s11 = spop %1084 }
 0x2b7   :  { %s397_s12 = smul.f32 0.00024414063, %s1085_s11 }
 0x2b8   :  { %s1087_s13 = spop %1086 }
 0x2b9   :  { %s399_s14 = smul.f32 %s397_s12, %s397_s12  ;;  %v411_v39 = vstv %s397_s12 }
 0x2ba   :  { %s398_s15 = smul.f32 0.00024414063, %s1087_s13  ;;  %v467_v40 = vsub.f32 %v1333_v58, %v411_v39  ;;  %v469_v41 = vsub.f32 %v1343_v9, %v411_v39  ;;  %v471_v42 = vsub.f32 %v1359_v30, %v411_v39  ;;  %v465_v43 = vsub.f32 %v1337_v61, %v411_v39  ;;  %v487_v9 = vpop.permute.xlu1 %486 }
 0x2bc   :  { %s400_s16 = ssub.f32 %s398_s15, %s399_s14 }
 0x2be   :  { %s401_s17 = sadd.f32 1e-08, %s400_s16  ;;  %v507_v22 = vpop.permute.xlu1 %506 }
 0x2c0   :  { %v402_v28 = vstv %s401_s17 }
 0x2c1   :  { %1134 = vrsqrt.f32 %v402_v28 }
 0x2c2   :  { %v511_v30 = vpop.permute.xlu1 %510 }
 0x2c6   :  { %v491_v48 = vpop.permute.xlu1 %490 }
 0x2ca   :  { %v495_v49 = vpop.permute.xlu1 %494 }
 0x2cb   :  { %v1135_v35 = vpop.eup %1134 }
 0x2cc   :  { %1088 = vpush %v1135_v35 }
 0x2cd   :  { %1090 = vpush %v427_v36 }
 0x2ce   :  { %1092 = vpush %v443_v37  ;;  %v515_v53 = vpop.permute.xlu1 %514 }
 0x2d2   :  { %v519_v25 = vpop.permute.xlu1 %518 }
 0x2fd   :  { %s1089_s18 = spop %1088 }
 0x2fe   :  { %v414_v44 = vstv %s1089_s18  ;;  %s1091_s19 = spop %1090 }
 0x2ff   :  { %v475_v45 = vmul.f32 %v467_v40, %v414_v44  ;;  %v477_v46 = vmul.f32 %v469_v41, %v414_v44  ;;  %v479_v47 = vmul.f32 %v471_v42, %v414_v44  ;;  %s445_s20 = smul.f32 0.00024414063, %s1091_s19  ;;  %s1093_s21 = spop %1092  ;;  %v473_v19 = vmul.f32 %v465_v43, %v414_v44  ;;  %v33_v41 = vld [vmem:[%s1581_s1 + $0x58] sm:$0xff]  ;;  %v34_v42 = vld [vmem:[%s1581_s1 + $0x60] sm:$0xff]  ;;  %v35_v43 = vld [vmem:[%s1581_s1 + $0x68] sm:$0xff] }
 0x300   :  { %s446_s22 = smul.f32 0.00024414063, %s1093_s21  ;;  %v36_v44 = vld [vmem:[%s1581_s1 + $0x70] sm:$0xff] }
 0x301   :  { %s447_s23 = smul.f32 %s445_s20, %s445_s20  ;;  %v459_v51 = vstv %s445_s20  ;;  %v499_v54 = vmul.f32 %v487_v9, %v475_v45  ;;  %v497_v55 = vmul.f32 %v483_v50, %v473_v19  ;;  %v501_v13 = vmul.f32 %v491_v48, %v477_v46  ;;  %v37_v45 = vld [vmem:[%s1581_s1 + $0x78] sm:$0xff] }
 0x302   :  { %v466_v21 = vsub.f32 %v1339_v62, %v459_v51  ;;  %v468_v56 = vsub.f32 %v1335_v60, %v459_v51  ;;  %v470_v24 = vsub.f32 %v1347_v17, %v459_v51  ;;  %v472_v57 = vsub.f32 %v1362_v34, %v459_v51 }
 0x303   :  { %s448_s24 = ssub.f32 %s446_s22, %s447_s23  ;;  %v523_v10 = vadd.f32 %v511_v30, %v499_v54  ;;  %v521_v20 = vadd.f32 %v507_v22, %v497_v55  ;;  %v503_v23 = vmul.f32 %v495_v49, %v479_v47  ;;  %v525_v32 = vadd.f32 %v515_v53, %v501_v13  ;;  %v539_v47 = vpop.permute.xlu1 %538 }
 0x304   :  { %v1148_v46 = vmov 3  }
 0x305   :  { %s449_s25 = sadd.f32 1e-08, %s448_s24  ;;  %v1398_v34 = vadd.f32 %v521_v20, %v1184_v2  ;;  %v527_v33 = vadd.f32 %v519_v25, %v503_v23  ;;  %v1401_v35 = vadd.f32 %v523_v10, %v1192_v6  ;;  %v1418_v40 = vadd.f32 %v525_v32, %v1212_v11  ;;  %v31_v11 = vld [vmem:[%s1581_s1 + $0x48] sm:$0xff]  ;;  %1129 = vset.pattern.permute.xlu1 %v1148_v46 }
 0x306   :  { %1128 = vset.pattern.permute.xlu0 %v1148_v46  ;;  %727 = vperm.xlu1 %1129, %v1235_v16  }
 0x307   :  { %v450_v58 = vstv %s449_s25  ;;  %v1421_v6 = vadd.f32 %v527_v33, %v1217_v12  ;;  %v32_v12 = vld [vmem:[%s1581_s1 + $0x50] sm:$0xff]  ;;  %723 = vperm.xlu0 %1128, %v1224_v14  }
 0x308   :  { %1136 = vrsqrt.f32 %v450_v58 }
 0x30a   :  { %731 = vperm.xlu1 %1129, %v1230_v15  }
 0x30b   :  { %735 = vperm.xlu0 %1128, %v1244_v18  }
 0x312   :  { %v1137_v61 = vpop.eup %1136 }
 0x313   :  { %1094 = vpush %v1137_v61  ;;  %v543_v61 = vpop.permute.xlu0 %542 }
 0x344   :  { %s1095_s2 = spop %1094 }
 0x345   :  { %v462_v52 = vstv %s1095_s2 }
 0x346   :  { %v474_v59 = vmul.f32 %v466_v21, %v462_v52  ;;  %v476_v63 = vmul.f32 %v468_v56, %v462_v52  ;;  %v478_v4 = vmul.f32 %v470_v24, %v462_v52  ;;  %v480_v5 = vmul.f32 %v472_v57, %v462_v52 }
 0x348   :  { %v498_v26 = vmul.f32 %v483_v50, %v474_v59  ;;  %v500_v27 = vmul.f32 %v487_v9, %v476_v63  ;;  %v502_v28 = vmul.f32 %v491_v48, %v478_v4  ;;  %v504_v62 = vmul.f32 %v495_v49, %v480_v5  ;;  %v547_v50 = vpop.permute.xlu1 %546 }
 0x34a   :  { %v522_v29 = vadd.f32 %v507_v22, %v498_v26  ;;  %v524_v60 = vadd.f32 %v511_v30, %v500_v27  ;;  %v526_v31 = vadd.f32 %v515_v53, %v502_v28  ;;  %v528_v17 = vadd.f32 %v519_v25, %v504_v62 }
 0x34c   :  { %v1404_v36 = vadd.f32 %v522_v29, %v1174_v0  ;;  %v1407_v37 = vadd.f32 %v524_v60, %v1179_v1  ;;  %v1410_v38 = vadd.f32 %v526_v31, %v1197_v7  ;;  %v1413_v39 = vadd.f32 %v528_v17, %v1202_v8  ;;  %v30_v8 = vld [vmem:[%s1581_s1 + $0x40] sm:$0xff]  ;;  %v551_v63 = vpop.permute.xlu1 %550  ;;  %v555_v60 = vpop.permute.xlu0 %554 }
 0x34d   :  { %v1062_v0 = vpack.c.bf16 %v1401_v35, %v1398_v34  ;;  %v1066_v7 = vpack.c.bf16 %v1421_v6, %v1418_v40 }
 0x34e   :  { %v1060_v2 = vpack.c.bf16 %v1407_v37, %v1404_v36  ;;  %v1064_v1 = vpack.c.bf16 %v1413_v39, %v1410_v38 }
 0x350   :  { %1061 = vmatprep.subr.bf16.mxu1 %v1060_v2  ;;  %v559_v32 = vpop.permute.xlu1 %558 }
 0x351   :  { %1063 = vmatpush1.bf16.msra.mxu1 %v1062_v0 }
 0x352   :  { %1065 = vmatprep.subr.bf16.mxu1 %v1064_v1 }
 0x355   :  { %1067 = vmatpush1.bf16.msra.mxu1 %v1066_v7 }
 0x358   :  { %1020 = vmatmul.mubr.msk.f32.vlgmr.msra.gmra.mrb[8].mxu1 %vm97_vm0, %v30_v8 }
 0x359   :  { %663 = vmatprep.mubr.f32.mxu1 %v1142_v3 }
 0x35c   :  { %1021 = vmatmul.mubr.msk.f32.gmra.mrb[10].mxu1 %vm97_vm0, %v31_v11 }
 0x35d   :  { %669 = vmatprep.mubr.f32.mxu1 %v1142_v3 }
 0x360   :  { %1022 = vmatmul.mubr.msk.f32.gmra.mrb[12].mxu1 %vm97_vm0, %v32_v12 }
 0x361   :  { %675 = vmatprep.mubr.f32.mxu1 %v1142_v3 }
 0x364   :  { %1023 = vmatmul.mubr.msk.f32.gmra.mrb[14].mxu1 %vm97_vm0, %v33_v41 }
 0x365   :  { %681 = vmatprep.mubr.f32.mxu1 %v1142_v3 }
 0x368   :  { %1024 = vmatmul.mubr.msk.f32.gmra.mrb[16].mxu1 %vm97_vm0, %v34_v42 }
 0x369   :  { %687 = vmatprep.mubr.f32.mxu1 %v1142_v3 }
 0x36c   :  { %1025 = vmatmul.mubr.msk.f32.gmra.mrb[18].mxu1 %vm97_vm0, %v35_v43 }
 0x36d   :  { %693 = vmatprep.mubr.f32.mxu1 %v1142_v3 }
 0x370   :  { %1026 = vmatmul.mubr.msk.f32.gmra.mrb[20].mxu1 %vm97_vm0, %v36_v44 }
 0x371   :  { %699 = vmatprep.mubr.f32.mxu1 %v1142_v3 }
 0x374   :  { %1027 = vmatmul.mubr.msk.f32.gmra.mrb[22].mxu1 %vm97_vm0, %v37_v45  ;;  %v563_v45 = vpop.permute.xlu0 %562 }
 0x42b   :  { %v659_v19 = vpop.f32.mrb[8].mxu1 }
 0x42c   :  { %v661_v58 = vpop.f32.mrb[9].mxu1  ;;  %v660_v9 = vadd.f32 %v659_v19, %v539_v47  ;;  %v567_v19 = vpop.permute.xlu1 %566 }
 0x42d   :  { %v662_v22 = vadd.f32 %v661_v58, %v539_v47 }
 0x42e   :  { %v706_v53 = vmax.f32 %v660_v9, 0.0 }
 0x42f   :  { %v665_v30 = vpop.f32.mrb[10].mxu1  ;;  %v707_v55 = vmax.f32 %v662_v22, 0.0 }
 0x430   :  { %v666_v48 = vadd.f32 %v665_v30, %v543_v61  ;;  %v667_v49 = vpop.f32.mrb[11].mxu1 }
 0x431   :  { %v668_v51 = vadd.f32 %v667_v49, %v543_v61 }
 0x432   :  { %v708_v54 = vmax.f32 %v666_v48, 0.0 }
 0x433   :  { %v709_v21 = vmax.f32 %v668_v51, 0.0  ;;  %v671_v56 = vpop.f32.mrb[12].mxu1 }
 0x434   :  { %v1070_v24 = vpack.c.bf16 %v708_v54, %v706_v53  ;;  %v673_v57 = vpop.f32.mrb[13].mxu1  ;;  %v672_v59 = vadd.f32 %v671_v56, %v547_v50  ;;  %v44_v56 = vld [vmem:[%s1581_s1 + $0xb0] sm:$0xff] }
 0x435   :  { %v1068_v52 = vpack.c.bf16 %v709_v21, %v707_v55  ;;  %v674_v4 = vadd.f32 %v673_v57, %v547_v50  ;;  %v42_v55 = vld [vmem:[%s1581_s1 + $0xa0] sm:$0xff]  ;;  %v43_v21 = vld [vmem:[%s1581_s1 + $0xa8] sm:$0xff]  ;;  %v1149_v57 = vmov 5  }
 0x436   :  { %v710_v23 = vmax.f32 %v672_v59, 0.0  ;;  %1131 = vset.pattern.permute.xlu1 %v1149_v57  ;;  %1130 = vset.pattern.permute.xlu0 %v1149_v57 }
 0x437   :  { %v677_v5 = vpop.f32.mrb[14].mxu1  ;;  %1069 = vmatprep.subr.bf16.mxu0 %v1068_v52  ;;  %v711_v26 = vmax.f32 %v674_v4, 0.0  ;;  %v724_v4 = vpop.permute.xlu0 %723 }
 0x438   :  { %v678_v10 = vadd.f32 %v677_v5, %v551_v63  ;;  %v679_v13 = vpop.f32.mrb[15].mxu1  ;;  %1071 = vmatpush1.bf16.msra.mxu0 %v1070_v24  ;;  %v45_v24 = vld [vmem:[%s1581_s1 + $0xb8] sm:$0xff] }
 0x439   :  { %v680_v20 = vadd.f32 %v679_v13, %v551_v63  ;;  %v728_v63 = vpop.permute.xlu1 %727 }
 0x43a   :  { %v712_v25 = vmax.f32 %v678_v10, 0.0 }
 0x43b   :  { %v713_v27 = vmax.f32 %v680_v20, 0.0  ;;  %v683_v28 = vpop.f32.mrb[16].mxu1 }
 0x43c   :  { %v1074_v62 = vpack.c.bf16 %v712_v25, %v710_v23  ;;  %v685_v29 = vpop.f32.mrb[17].mxu1  ;;  %v684_v17 = vadd.f32 %v683_v28, %v555_v60 }
 0x43d   :  { %v1072_v31 = vpack.c.bf16 %v713_v27, %v711_v26  ;;  %v686_v33 = vadd.f32 %v685_v29, %v555_v60  ;;  %v732_v26 = vpop.permute.xlu1 %731 }
 0x43e   :  { %v714_v8 = vmax.f32 %v684_v17, 0.0 }
 0x43f   :  { %v689_v2 = vpop.f32.mrb[18].mxu1  ;;  %1073 = vmatprep.subr.bf16.mxu0 %v1072_v31  ;;  %v715_v12 = vmax.f32 %v686_v33, 0.0 }
 0x440   :  { %v690_v0 = vadd.f32 %v689_v2, %v559_v32  ;;  %v691_v1 = vpop.f32.mrb[19].mxu1  ;;  %1075 = vmatpush1.bf16.msra.mxu0 %v1074_v62 }
 0x441   :  { %v692_v7 = vadd.f32 %v691_v1, %v559_v32 }
 0x442   :  { %v716_v11 = vmax.f32 %v690_v0, 0.0  ;;  %v736_v0 = vpop.permute.xlu0 %735 }
 0x443   :  { %v717_v41 = vmax.f32 %v692_v7, 0.0  ;;  %v695_v42 = vpop.f32.mrb[20].mxu1 }
 0x444   :  { %v1078_v43 = vpack.c.bf16 %v716_v11, %v714_v8  ;;  %v697_v44 = vpop.f32.mrb[21].mxu1  ;;  %v696_v47 = vadd.f32 %v695_v42, %v563_v45 }
 0x445   :  { %v1076_v46 = vpack.c.bf16 %v717_v41, %v715_v12  ;;  %v698_v58 = vadd.f32 %v697_v44, %v563_v45 }
 0x446   :  { %v718_v48 = vmax.f32 %v696_v47, 0.0 }
 0x447   :  { %v701_v61 = vpop.f32.mrb[22].mxu1  ;;  %1077 = vmatprep.subr.bf16.mxu0 %v1076_v46  ;;  %v719_v50 = vmax.f32 %v698_v58, 0.0 }
 0x448   :  { %v702_v9 = vadd.f32 %v701_v61, %v567_v19  ;;  %v703_v22 = vpop.f32.mrb[23].mxu1  ;;  %1079 = vmatpush1.bf16.msra.mxu0 %v1078_v43 }
 0x449   :  { %v704_v30 = vadd.f32 %v703_v22, %v567_v19 }
 0x44a   :  { %v720_v49 = vmax.f32 %v702_v9, 0.0 }
 0x44b   :  { %v721_v51 = vmax.f32 %v704_v30, 0.0  ;;  %v1150_v30 = vmov 7  }
 0x44c   :  { %v1082_v53 = vpack.c.bf16 %v720_v49, %v718_v48 }
 0x44d   :  { %v1080_v54 = vpack.c.bf16 %v721_v51, %v719_v50 }
 0x44f   :  { %1081 = vmatprep.subr.bf16.mxu0 %v1080_v54 }
 0x450   :  { %1083 = vmatpush1.bf16.msra.mxu0 %v1082_v53 }
 0x453   :  { %1028 = vmatmul.mubr.msk.f32.vlgmr.msra.gmra.mrb[16].mxu0 %vm267_vm1, %v42_v55 }
 0x454   :  { %820 = vmatprep.mubr.f32.mxu0 %v1142_v3 }
 0x457   :  { %1029 = vmatmul.mubr.msk.f32.gmra.mrb[18].mxu0 %vm267_vm1, %v43_v21 }
 0x458   :  { %826 = vmatprep.mubr.f32.mxu0 %v1142_v3 }
 0x45b   :  { %1030 = vmatmul.mubr.msk.f32.gmra.mrb[20].mxu0 %vm267_vm1, %v44_v56 }
 0x45c   :  { %832 = vmatprep.mubr.f32.mxu0 %v1142_v3 }
 0x45f   :  { %1031 = vmatmul.mubr.msk.f32.gmra.mrb[22].mxu0 %vm267_vm1, %v45_v24 }
 0x526   :  { %v816_v52 = vpop.f32.mrb[16].mxu0 }
 0x527   :  { %v818_v59 = vpop.f32.mrb[17].mxu0  ;;  %v1495_v3 = vadd.f32 %v816_v52, %v724_v4 }
 0x528   :  { %v1497_v23 = vadd.f32 %v818_v59, %v724_v4 }
 0x529   :  { %v851_v31 = vmul.f32 %v1495_v3, %v1495_v3 }
 0x52a   :  { %v822_v5 = vpop.f32.mrb[18].mxu0  ;;  %v893_v33 = vmul.f32 %v1497_v23, %v1497_v23 }
 0x52b   :  { %v1491_v10 = vadd.f32 %v822_v5, %v728_v63  ;;  %v824_v13 = vpop.f32.mrb[19].mxu0 }
 0x52c   :  { %v1493_v20 = vadd.f32 %v824_v13, %v728_v63 }
 0x52d   :  { %v852_v27 = vmul.f32 %v1491_v10, %v1491_v10  ;;  %v839_v17 = vadd.f32 %v1491_v10, %v1495_v3 }
 0x52e   :  { %v828_v25 = vpop.f32.mrb[20].mxu0  ;;  %v894_v29 = vmul.f32 %v1493_v20, %v1493_v20  ;;  %v881_v19 = vadd.f32 %v1493_v20, %v1497_v23 }
 0x52f   :  { %v1501_v28 = vadd.f32 %v828_v25, %v732_v26  ;;  %v830_v62 = vpop.f32.mrb[21].mxu0  ;;  %v855_v12 = vadd.f32 %v852_v27, %v851_v31 }
 0x530   :  { %v1505_v60 = vadd.f32 %v830_v62, %v732_v26  ;;  %v897_v42 = vadd.f32 %v894_v29, %v893_v33 }
 0x531   :  { %v853_v32 = vmul.f32 %v1501_v28, %v1501_v28  ;;  %v840_v11 = vadd.f32 %v839_v17, %v1501_v28 }
 0x532   :  { %v895_v2 = vmul.f32 %v1505_v60, %v1505_v60  ;;  %v834_v1 = vpop.f32.mrb[22].mxu0  ;;  %v882_v9 = vadd.f32 %v881_v19, %v1505_v60 }
 0x533   :  { %v1517_v7 = vadd.f32 %v834_v1, %v736_v0  ;;  %v836_v8 = vpop.f32.mrb[23].mxu0  ;;  %v856_v45 = vadd.f32 %v855_v12, %v853_v32 }
 0x534   :  { %v1520_v41 = vadd.f32 %v836_v8, %v736_v0  ;;  %v898_v47 = vadd.f32 %v897_v42, %v895_v2 }
 0x535   :  { %v841_v43 = vadd.f32 %v840_v11, %v1517_v7  ;;  %v854_v44 = vmul.f32 %v1517_v7, %v1517_v7 }
 0x536   :  { %v896_v46 = vmul.f32 %v1520_v41, %v1520_v41  ;;  %v883_v22 = vadd.f32 %v882_v9, %v1520_v41 }
 0x537   :  { %842 = vadd.xlane.f32.xlu1 %v841_v43  ;;  %v857_v58 = vadd.f32 %v856_v45, %v854_v44 }
 0x538   :  { %v899_v61 = vadd.f32 %v898_v47, %v896_v46 }
 0x539   :  { %858 = vadd.xlane.f32.xlu0 %v857_v58 }
 0x53b   :  { %900 = vadd.xlane.f32.xlu1 %v899_v61 }
 0x53d   :  { %884 = vadd.xlane.f32.xlu0 %v883_v22 }
 0x54c   :  { %944 = vperm.xlu1 %1131, %v1235_v16  }
 0x550   :  { %948 = vperm.xlu1 %1131, %v1230_v15  }
 0x553   :  { %940 = vperm.xlu0 %1130, %v1224_v14  }
 0x554   :  { %952 = vperm.xlu1 %1131, %v1244_v18  }
 0x557   :  { %1133 = vset.pattern.permute.xlu0 %v1150_v30 }
 0x558   :  { %1132 = vset.pattern.permute.xlu1 %v1150_v30 }
 0x559   :  { %964 = vperm.xlu1 %1132, %v1224_v14  }
 0x55d   :  { %968 = vperm.xlu1 %1132, %v1235_v16  }
 0x561   :  { %972 = vperm.xlu1 %1132, %v1230_v15  }
 0x565   :  { %976 = vperm.xlu1 %1132, %v1244_v18  }
 0x5c4   :  { %v843_v48 = vpop.xlane.xlu1 %842 }
 0x5c5   :  { %v844_v49 = vrot.slane %v843_v48, 4 }
 0x5c6   :  { %v859_v50 = vpop.xlane.xlu0 %858 }
 0x5c7   :  { %v845_v51 = vadd.f32 %v844_v49, %v843_v48  ;;  %v860_v53 = vrot.slane %v859_v50, 4 }
 0x5c8   :  { %v901_v15 = vpop.xlane.xlu1 %900 }
 0x5c9   :  { %v846_v54 = vrot.slane %v845_v51, 2  ;;  %v861_v55 = vadd.f32 %v860_v53, %v859_v50  ;;  %v902_v63 = vrot.slane %v901_v15, 4 }
 0x5ca   :  { %v885_v16 = vpop.xlane.xlu0 %884 }
 0x5cb   :  { %v862_v21 = vrot.slane %v861_v55, 2  ;;  %v847_v56 = vadd.f32 %v846_v54, %v845_v51  ;;  %v886_v18 = vrot.slane %v885_v16, 4  ;;  %v903_v5 = vadd.f32 %v902_v63, %v901_v15 }
 0x5cc   :  { %v945_v2 = vpop.permute.xlu1 %944 }
 0x5cd   :  { %v848_v24 = vrot.slane %v847_v56, 1  ;;  %v863_v57 = vadd.f32 %v862_v21, %v861_v55  ;;  %v887_v4 = vadd.f32 %v886_v18, %v885_v16  ;;  %v904_v25 = vrot.slane %v903_v5, 2 }
 0x5cf   :  { %v849_v52 = vadd.f32 %v848_v24, %v847_v56  ;;  %v864_v59 = vrot.slane %v863_v57, 1  ;;  %v888_v13 = vrot.slane %v887_v4, 2  ;;  %v905_v62 = vadd.f32 %v904_v25, %v903_v5 }
 0x5d0   :  { %v949_v0 = vpop.permute.xlu1 %948 }
 0x5d1   :  { %1096 = vpush %v849_v52  ;;  %v865_v14 = vadd.f32 %v864_v59, %v863_v57  ;;  %v889_v27 = vadd.f32 %v888_v13, %v887_v4  ;;  %v906_v31 = vrot.slane %v905_v62, 1 }
 0x5d2   :  { %v941_v19 = vpop.permute.xlu0 %940 }
 0x5d3   :  { %1098 = vpush %v865_v14  ;;  %v890_v29 = vrot.slane %v889_v27, 1  ;;  %v907_v33 = vadd.f32 %v906_v31, %v905_v62 }
 0x5d4   :  { %v953_v1 = vpop.permute.xlu1 %952 }
 0x5d5   :  { %v891_v32 = vadd.f32 %v890_v29, %v889_v27 }
 0x5d8   :  { %v965_v8 = vpop.permute.xlu1 %964 }
 0x5dc   :  { %v969_v11 = vpop.permute.xlu1 %968 }
 0x5e0   :  { %v973_v42 = vpop.permute.xlu1 %972 }
 0x5e4   :  { %v977_v49 = vpop.permute.xlu1 %976 }
 0x602   :  { %s1097_s1 = spop %1096 }
 0x603   :  { %s867_s22 = smul.f32 0.00024414063, %s1097_s1 }
 0x604   :  { %s1099_s23 = spop %1098 }
 0x605   :  { %s869_s24 = smul.f32 %s867_s22, %s867_s22  ;;  %v875_v12 = vstv %s867_s22 }
 0x606   :  { %s868_s25 = smul.f32 0.00024414063, %s1099_s23  ;;  %v925_v43 = vsub.f32 %v1491_v10, %v875_v12  ;;  %v927_v44 = vsub.f32 %v1501_v28, %v875_v12  ;;  %v923_v45 = vsub.f32 %v1495_v3, %v875_v12  ;;  %v929_v46 = vsub.f32 %v1517_v7, %v875_v12 }
 0x608   :  { %s870_s2 = ssub.f32 %s868_s25, %s869_s24 }
 0x60a   :  { %s871_s26 = sadd.f32 1e-08, %s870_s2 }
 0x60c   :  { %v872_v26 = vstv %s871_s26 }
 0x60d   :  { %1138 = vrsqrt.f32 %v872_v26 }
 0x617   :  { %v1139_v17 = vpop.eup %1138 }
 0x618   :  { %1100 = vpush %v1139_v17 }
 0x619   :  { %1102 = vpush %v891_v32 }
 0x61a   :  { %1104 = vpush %v907_v33 }
 0x649   :  { %s1101_s27 = spop %1100 }
 0x64a   :  { %v878_v47 = vstv %s1101_s27  ;;  %s1103_s28 = spop %1102 }
 0x64b   :  { %v933_v58 = vmul.f32 %v925_v43, %v878_v47  ;;  %v935_v61 = vmul.f32 %v927_v44, %v878_v47  ;;  %s909_s29 = smul.f32 0.00024414063, %s1103_s28  ;;  %s1105_s30 = spop %1104  ;;  %v931_v9 = vmul.f32 %v923_v45, %v878_v47  ;;  %v937_v22 = vmul.f32 %v929_v46, %v878_v47 }
 0x64c   :  { %s910_s4 = smul.f32 0.00024414063, %s1105_s30 }
 0x64d   :  { %v957_v30 = vmul.f32 %v945_v2, %v933_v58  ;;  %s911_s0 = smul.f32 %s909_s29, %s909_s29  ;;  %v959_v48 = vmul.f32 %v949_v0, %v935_v61  ;;  %v955_v10 = vmul.f32 %v941_v19, %v931_v9  ;;  %v961_v28 = vmul.f32 %v953_v1, %v937_v22 }
 0x64f   :  { %v981_v50 = vadd.f32 %v969_v11, %v957_v30  ;;  %s912_s5 = ssub.f32 %s910_s4, %s911_s0  ;;  %v983_v3 = vadd.f32 %v973_v42, %v959_v48  ;;  %v979_v7 = vadd.f32 %v965_v8, %v955_v10  ;;  %v985_v51 = vadd.f32 %v977_v49, %v961_v28 }
 0x651   :  { %v989_v53 = vadd.f32 %v981_v50, %v1401_v35  ;;  %s913_s6 = sadd.f32 1e-08, %s912_s5  ;;  %v991_v54 = vadd.f32 %v983_v3, %v1418_v40  ;;  %v987_v55 = vadd.f32 %v979_v7, %v1398_v34  ;;  %v993_v21 = vadd.f32 %v985_v51, %v1421_v6 }
 0x652   :  { %v917_v35 = vstv %s909_s29 }
 0x653   :  { %996 = vst [vmem:[%s1582_s3 + $0x8] sm:$0xff] %v989_v53  ;;  %v914_v56 = vstv %s913_s6  ;;  %997 = vst [vmem:[%s1582_s3 + $0x10] sm:$0xff] %v991_v54  ;;  %v924_v40 = vsub.f32 %v1497_v23, %v917_v35  ;;  %v926_v6 = vsub.f32 %v1493_v20, %v917_v35  ;;  %v928_v24 = vsub.f32 %v1505_v60, %v917_v35 }
 0x654   :  { %995 = vst [vmem:[%s1582_s3] sm:$0xff] %v987_v55  ;;  %1140 = vrsqrt.f32 %v914_v56  ;;  %998 = vst [vmem:[%s1582_s3 + $0x18] sm:$0xff] %v993_v21  ;;  %v930_v57 = vsub.f32 %v1520_v41, %v917_v35 }
 0x65e   :  { %v1141_v34 = vpop.eup %1140 }
 0x65f   :  { %1106 = vpush %v1141_v34 }
 0x690   :  { %s1107_s15 = spop %1106 }
 0x691   :  { %v920_v52 = vstv %s1107_s15 }
 0x692   :  { %v932_v59 = vmul.f32 %v924_v40, %v920_v52  ;;  %v934_v14 = vmul.f32 %v926_v6, %v920_v52  ;;  %v936_v16 = vmul.f32 %v928_v24, %v920_v52  ;;  %v938_v15 = vmul.f32 %v930_v57, %v920_v52 }
 0x694   :  { %v956_v18 = vmul.f32 %v941_v19, %v932_v59  ;;  %v958_v63 = vmul.f32 %v945_v2, %v934_v14  ;;  %v960_v4 = vmul.f32 %v949_v0, %v936_v16  ;;  %v962_v5 = vmul.f32 %v953_v1, %v938_v15 }
 0x696   :  { %v980_v13 = vadd.f32 %v965_v8, %v956_v18  ;;  %v982_v25 = vadd.f32 %v969_v11, %v958_v63  ;;  %v984_v26 = vadd.f32 %v973_v42, %v960_v4  ;;  %v986_v27 = vadd.f32 %v977_v49, %v962_v5 }
 0x698   :  { %v988_v23 = vadd.f32 %v980_v13, %v1404_v36  ;;  %v990_v20 = vadd.f32 %v982_v25, %v1407_v37  ;;  %v992_v60 = vadd.f32 %v984_v26, %v1410_v38  ;;  %v994_v41 = vadd.f32 %v986_v27, %v1413_v39 }
 0x69a   :  { %1032 = vst [vmem:[%s1582_s3 + $0x20] sm:$0xff] %v988_v23  ;;  %1033 = vst [vmem:[%s1582_s3 + $0x28] sm:$0xff] %v990_v20 }
 0x69b   :  { %1034 = vst [vmem:[%s1582_s3 + $0x30] sm:$0xff] %v992_v60  ;;  %1035 = vst [vmem:[%s1582_s3 + $0x38] sm:$0xff] %v994_v41 }

</bundles_post_ra>
